<compile_context>
chip_gen: v7x
topology: tpu7x:2x2x1
jax: 0.10.0
libtpu: 0.0.40
codegen_flags: <defaults>
</compile_context>

<pallas_src>
import jax
import jax.numpy as jnp
from jax import lax
from jax.experimental import pallas as pl
from jax.experimental.pallas import tpu as pltpu


def make_attention(query_dim, heads, dim_head, seq_len, batch):
    inner_dim = heads * dim_head
    scale = dim_head ** -0.5

    def attention_kernel(x_ref, wqkv_ref, wo_ref, bo_ref, o_ref):
        # x_ref block: (1, N, D) -- keep native dtype, MXU accumulates in f32.
        x = x_ref[0]                                               # (N, D)

        # Fused projection: columns are [q*scale | k | v].
        qkv = jnp.dot(x, wqkv_ref[...],
                      preferred_element_type=jnp.float32)          # (N, 3*inner)
        q = qkv[:, :inner_dim]
        k = qkv[:, inner_dim:2 * inner_dim]
        v = qkv[:, 2 * inner_dim:]

        wo = wo_ref[...]                                           # (inner, D)

        # Accumulate the output projection per head (folds away the concat).
        acc = jnp.zeros((seq_len, query_dim), dtype=jnp.float32)
        for h in range(heads):                                     # heads is small & static
            lo = h * dim_head
            hi = lo + dim_head
            qh = q[:, lo:hi]                                       # (N, dh)
            kh = k[:, lo:hi]                                       # (N, dh)
            vh = v[:, lo:hi]                                       # (N, dh)

            # sim = qh @ kh^T, contracting last dims in place (no transpose).
            sim = lax.dot_general(qh, kh, (((1,), (1,)), ((), ())),
                                  preferred_element_type=jnp.float32)  # (N, N)
            sim = sim - jnp.max(sim, axis=-1, keepdims=True)
            p = jnp.exp(sim)
            denom = jnp.sum(p, axis=-1, keepdims=True)             # (N, 1)

            o_h = jnp.dot(p, vh, preferred_element_type=jnp.float32)   # (N, dh)
            # Deferred softmax normalization (EUP reciprocal, per-head denom).
            o_h = o_h * pl.reciprocal(denom, approx=True)
            # dropout(p=0.0) is identity.

            acc = acc + jnp.dot(o_h, wo[lo:hi, :],
                                preferred_element_type=jnp.float32)    # (N, D)

        y = acc + bo_ref[0]                                        # (N, D)
        o_ref[0] = y.astype(o_ref.dtype)

    def forward(x, wq, wkv, wo, bo):
        B, N, D = x.shape
        assert (B, N, D) == (batch, seq_len, query_dim)

        # Fold the attention scale into wq and fuse the two projection weights.
        wqkv = jnp.concatenate([wq * scale, wkv], axis=1)          # (D, 3*inner)
        bo2 = bo.reshape(1, query_dim)

        # Per-step VMEM footprint (double-buffered blocks) + headroom.
        itemsize = jnp.dtype(x.dtype).itemsize
        block_bytes = 2 * (2 * N * D * itemsize                       # x + out blocks
                           + (D * 3 * inner_dim + inner_dim * D + D) * 4)  # weights/bias
        vmem_limit = int(min(block_bytes + (8 << 20), 64 << 20))

        return pl.pallas_call(
            attention_kernel,
            out_shape=jax.ShapeDtypeStruct((B, N, D), x.dtype),
            grid=(B,),
            in_specs=[
                pl.BlockSpec((1, N, D), lambda b: (b, 0, 0)),
                pl.BlockSpec((D, 3 * inner_dim), lambda b: (0, 0)),
                pl.BlockSpec((inner_dim, D), lambda b: (0, 0)),
                pl.BlockSpec((1, D), lambda b: (0, 0)),
            ],
            out_specs=pl.BlockSpec((1, N, D), lambda b: (b, 0, 0)),
            compiler_params=pltpu.CompilerParams(
                dimension_semantics=("parallel",),
                vmem_limit_bytes=vmem_limit),
        )(x, wqkv, wo, bo2)

    return forward


def reference_attention(x, wq, wkv, wo, bo, heads, dim_head):
    # pure-JAX reference (mirrors the PyTorch forward)
    B, N, D = x.shape
    inner = heads * dim_head
    scale = dim_head ** -0.5
    q = x @ wq                       # (B, N, inner)
    kv = x @ wkv                     # (B, N, 2*inner)
    k, v = kv[..., :inner], kv[..., inner:]

    def split_heads(t):              # 'b n (h d) -> (b h) n d'
        return t.reshape(B, N, heads, dim_head).transpose(0, 2, 1, 3).reshape(B * heads, N, dim_head)

    q, k, v = map(split_heads, (q, k, v))
    sim = jnp.einsum('bid,bjd->bij', q, k) * scale
    attn = jax.nn.softmax(sim, axis=-1)
    out = jnp.einsum('bij,bjd->bid', attn, v)
    out = out.reshape(B, heads, N, dim_head).transpose(0, 2, 1, 3).reshape(B, N, inner)
    return out @ wo + bo


if __name__ == "__main__":
    # small, module-consistent shapes (lane-dense D so the output store is a
    # full 128-lane vst)
    B, N = 2, 8
    query_dim = 128
    heads = 2
    dim_head = 64
    inner_dim = heads * dim_head     # 128

    key = jax.random.PRNGKey(0)
    kx, kq, kkv, kwo, kbo = jax.random.split(key, 5)

    x = jax.random.normal(kx, (B, N, query_dim), dtype=jnp.float32)
    # Linear weights, stored as [in, out] (i.e. PyTorch weight.T)
    wq = jax.random.normal(kq, (query_dim, inner_dim), dtype=jnp.float32) * 0.05
    wkv = jax.random.normal(kkv, (query_dim, 2 * inner_dim), dtype=jnp.float32) * 0.05
    wo = jax.random.normal(kwo, (inner_dim, query_dim), dtype=jnp.float32) * 0.05
    bo = jax.random.normal(kbo, (query_dim,), dtype=jnp.float32) * 0.05

    # TODO(synk): optional `mask` / separate `context` arguments not wired into
    # the kernel (module defaults context=x, mask=None, dropout=0.0).
    # TODO(synk): for long sequences, switch to a KV-tiled online-softmax grid
    # (flash-style) and add a heads/q-tile parallel axis for v7x megacore.

    attn_fn = make_attention(query_dim, heads, dim_head, N, B)
    y = attn_fn(x, wq, wkv, wo, bo)
    jax.block_until_ready(y)

    y_ref = reference_attention(x, wq, wkv, wo, bo, heads, dim_head)
    assert jnp.allclose(y, y_ref, atol=2e-3, rtol=2e-3), "mismatch vs reference"

    print("KERNEL_OK")
</pallas_src>

<mosaic_0001>
module attributes {stable_mosaic.version = 11 : i64} {
  func.func @attention_kernel(%arg0: i32, %arg1: memref<1x8x128xf32, #tpu.memory_space<vmem>>, %arg2: memref<128x384xf32, #tpu.memory_space<vmem>>, %arg3: memref<128x128xf32, #tpu.memory_space<vmem>>, %arg4: memref<1x128xf32, #tpu.memory_space<vmem>>, %arg5: memref<1x8x128xf32, #tpu.memory_space<vmem>>) attributes {dimension_semantics = [#tpu.dimension_semantics<parallel>], iteration_bounds = array<i64: 2>, scalar_prefetch = 0 : i64, scratch_operands = 0 : i64, tpu.core_type = #tpu.core_type<tc>, window_params = [{transform_indices = @transform_0, window_bounds = array<i64: 1, 8, 128>}, {pipeline_mode = #tpu.pipeline_mode<synchronous>, transform_indices = @transform_1, window_bounds = array<i64: 128, 384>}, {pipeline_mode = #tpu.pipeline_mode<synchronous>, transform_indices = @transform_2, window_bounds = array<i64: 128, 128>}, {pipeline_mode = #tpu.pipeline_mode<synchronous>, transform_indices = @transform_3, window_bounds = array<i64: 1, 128>}, {transform_indices = @transform_4, window_bounds = array<i64: 1, 8, 128>}]} {
    %c0 = arith.constant 0 : index
    %c0_0 = arith.constant 0 : index
    %c0_1 = arith.constant 0 : index
    %0 = vector.load %arg1[%c0, %c0_0, %c0_1] : memref<1x8x128xf32, #tpu.memory_space<vmem>>, vector<1x8x128xf32>
    %1 = vector.shape_cast %0 : vector<1x8x128xf32> to vector<8x128xf32>
    %c0_2 = arith.constant 0 : index
    %c0_3 = arith.constant 0 : index
    %2 = vector.load %arg2[%c0_2, %c0_3] : memref<128x384xf32, #tpu.memory_space<vmem>>, vector<128x384xf32>
    %cst = arith.constant dense<0.000000e+00> : vector<8x384xf32>
    %3 = tpu.matmul %1, %2, %cst {dimension_numbers = #tpu.dot_dimension_numbers<[1], [0], [0], [1], [0, 0, 1, 1], [], []>} : vector<8x128xf32>, vector<128x384xf32>, vector<8x384xf32> -> vector<8x384xf32>
    %4 = vector.extract_strided_slice %3 {offsets = [0, 0], sizes = [8, 128], strides = [1, 1]} : vector<8x384xf32> to vector<8x128xf32>
    %5 = vector.extract_strided_slice %3 {offsets = [0, 128], sizes = [8, 128], strides = [1, 1]} : vector<8x384xf32> to vector<8x128xf32>
    %6 = vector.extract_strided_slice %3 {offsets = [0, 256], sizes = [8, 128], strides = [1, 1]} : vector<8x384xf32> to vector<8x128xf32>
    %c0_4 = arith.constant 0 : index
    %c0_5 = arith.constant 0 : index
    %7 = vector.load %arg3[%c0_4, %c0_5] : memref<128x128xf32, #tpu.memory_space<vmem>>, vector<128x128xf32>
    %cst_6 = arith.constant 0.000000e+00 : f32
    %8 = vector.broadcast %cst_6 : f32 to vector<8x128xf32>
    %9 = vector.extract_strided_slice %4 {offsets = [0, 0], sizes = [8, 64], strides = [1, 1]} : vector<8x128xf32> to vector<8x64xf32>
    %10 = vector.extract_strided_slice %5 {offsets = [0, 0], sizes = [8, 64], strides = [1, 1]} : vector<8x128xf32> to vector<8x64xf32>
    %11 = vector.extract_strided_slice %6 {offsets = [0, 0], sizes = [8, 64], strides = [1, 1]} : vector<8x128xf32> to vector<8x64xf32>
    %cst_7 = arith.constant dense<0.000000e+00> : vector<8x8xf32>
    %12 = tpu.matmul %9, %10, %cst_7 {dimension_numbers = #tpu.dot_dimension_numbers<[1], [1], [0], [0], [0, 0, 1, 0], [], []>} : vector<8x64xf32>, vector<8x64xf32>, vector<8x8xf32> -> vector<8x8xf32>
    %cst_8 = arith.constant dense<0xFF800000> : vector<8xf32>
    %13 = vector.multi_reduction <maximumf>, %12, %cst_8 [1] : vector<8x8xf32> to vector<8xf32>
    %14 = vector.shape_cast %13 : vector<8xf32> to vector<8x1xf32>
    %15 = vector.broadcast %14 : vector<8x1xf32> to vector<8x8xf32>
    %16 = arith.subf %12, %15 : vector<8x8xf32>
    %17 = math.exp %16 : vector<8x8xf32>
    %cst_9 = arith.constant dense<0.000000e+00> : vector<8xf32>
    %18 = vector.multi_reduction <add>, %17, %cst_9 [1] : vector<8x8xf32> to vector<8xf32>
    %19 = vector.shape_cast %18 : vector<8xf32> to vector<8x1xf32>
    %cst_10 = arith.constant dense<0.000000e+00> : vector<8x64xf32>
    %20 = tpu.matmul %17, %11, %cst_10 {dimension_numbers = #tpu.dot_dimension_numbers<[1], [0], [0], [1], [0, 0, 1, 1], [], []>} : vector<8x8xf32>, vector<8x64xf32>, vector<8x64xf32> -> vector<8x64xf32>
    %21 = tpu.reciprocal %19 {approx = true} : vector<8x1xf32> -> vector<8x1xf32>
    %22 = vector.broadcast %21 : vector<8x1xf32> to vector<8x64xf32>
    %23 = arith.mulf %20, %22 : vector<8x64xf32>
    %24 = vector.extract_strided_slice %7 {offsets = [0, 0], sizes = [64, 128], strides = [1, 1]} : vector<128x128xf32> to vector<64x128xf32>
    %cst_11 = arith.constant dense<0.000000e+00> : vector<8x128xf32>
    %25 = tpu.matmul %23, %24, %cst_11 {dimension_numbers = #tpu.dot_dimension_numbers<[1], [0], [0], [1], [0, 0, 1, 1], [], []>} : vector<8x64xf32>, vector<64x128xf32>, vector<8x128xf32> -> vector<8x128xf32>
    %26 = arith.addf %8, %25 : vector<8x128xf32>
    %27 = vector.extract_strided_slice %4 {offsets = [0, 64], sizes = [8, 64], strides = [1, 1]} : vector<8x128xf32> to vector<8x64xf32>
    %28 = vector.extract_strided_slice %5 {offsets = [0, 64], sizes = [8, 64], strides = [1, 1]} : vector<8x128xf32> to vector<8x64xf32>
    %29 = vector.extract_strided_slice %6 {offsets = [0, 64], sizes = [8, 64], strides = [1, 1]} : vector<8x128xf32> to vector<8x64xf32>
    %cst_12 = arith.constant dense<0.000000e+00> : vector<8x8xf32>
    %30 = tpu.matmul %27, %28, %cst_12 {dimension_numbers = #tpu.dot_dimension_numbers<[1], [1], [0], [0], [0, 0, 1, 0], [], []>} : vector<8x64xf32>, vector<8x64xf32>, vector<8x8xf32> -> vector<8x8xf32>
    %cst_13 = arith.constant dense<0xFF800000> : vector<8xf32>
    %31 = vector.multi_reduction <maximumf>, %30, %cst_13 [1] : vector<8x8xf32> to vector<8xf32>
    %32 = vector.shape_cast %31 : vector<8xf32> to vector<8x1xf32>
    %33 = vector.broadcast %32 : vector<8x1xf32> to vector<8x8xf32>
    %34 = arith.subf %30, %33 : vector<8x8xf32>
    %35 = math.exp %34 : vector<8x8xf32>
    %cst_14 = arith.constant dense<0.000000e+00> : vector<8xf32>
    %36 = vector.multi_reduction <add>, %35, %cst_14 [1] : vector<8x8xf32> to vector<8xf32>
    %37 = vector.shape_cast %36 : vector<8xf32> to vector<8x1xf32>
    %cst_15 = arith.constant dense<0.000000e+00> : vector<8x64xf32>
    %38 = tpu.matmul %35, %29, %cst_15 {dimension_numbers = #tpu.dot_dimension_numbers<[1], [0], [0], [1], [0, 0, 1, 1], [], []>} : vector<8x8xf32>, vector<8x64xf32>, vector<8x64xf32> -> vector<8x64xf32>
    %39 = tpu.reciprocal %37 {approx = true} : vector<8x1xf32> -> vector<8x1xf32>
    %40 = vector.broadcast %39 : vector<8x1xf32> to vector<8x64xf32>
    %41 = arith.mulf %38, %40 : vector<8x64xf32>
    %42 = vector.extract_strided_slice %7 {offsets = [64, 0], sizes = [64, 128], strides = [1, 1]} : vector<128x128xf32> to vector<64x128xf32>
    %cst_16 = arith.constant dense<0.000000e+00> : vector<8x128xf32>
    %43 = tpu.matmul %41, %42, %cst_16 {dimension_numbers = #tpu.dot_dimension_numbers<[1], [0], [0], [1], [0, 0, 1, 1], [], []>} : vector<8x64xf32>, vector<64x128xf32>, vector<8x128xf32> -> vector<8x128xf32>
    %44 = arith.addf %26, %43 : vector<8x128xf32>
    %c0_17 = arith.constant 0 : index
    %c0_18 = arith.constant 0 : index
    %45 = vector.load %arg4[%c0_17, %c0_18] : memref<1x128xf32, #tpu.memory_space<vmem>>, vector<1x128xf32>
    %46 = vector.shape_cast %45 : vector<1x128xf32> to vector<128xf32>
    %47 = vector.shape_cast %46 : vector<128xf32> to vector<1x128xf32>
    %48 = vector.broadcast %47 : vector<1x128xf32> to vector<8x128xf32>
    %49 = arith.addf %44, %48 : vector<8x128xf32>
    %c0_19 = arith.constant 0 : index
    %c0_20 = arith.constant 0 : index
    %c0_21 = arith.constant 0 : index
    %50 = vector.load %arg5[%c0_19, %c0_20, %c0_21] : memref<1x8x128xf32, #tpu.memory_space<vmem>>, vector<1x8x128xf32>
    %51 = vector.shape_cast %50 : vector<1x8x128xf32> to vector<8x128xf32>
    %52 = vector.shape_cast %49 : vector<8x128xf32> to vector<1x8x128xf32>
    tpu.vector_store %arg5[%c0_19, %c0_20, %c0_21], %52 {strides = array<i32>} : memref<1x8x128xf32, #tpu.memory_space<vmem>>, vector<1x8x128xf32>,
    return
  }
  func.func @transform_0(%arg0: i32) -> (i32, i32, i32) {
    %c0_i32 = arith.constant 0 : i32
    %c0_i32_0 = arith.constant 0 : i32
    %c0_i32_1 = arith.constant 0 : i32
    return %arg0, %c0_i32, %c0_i32_0 : i32, i32, i32
  }
  func.func @transform_1(%arg0: i32) -> (i32, i32) {
    %c0_i32 = arith.constant 0 : i32
    %c0_i32_0 = arith.constant 0 : i32
    %c0_i32_1 = arith.constant 0 : i32
    return %c0_i32, %c0_i32_0 : i32, i32
  }
  func.func @transform_2(%arg0: i32) -> (i32, i32) {
    %c0_i32 = arith.constant 0 : i32
    %c0_i32_0 = arith.constant 0 : i32
    %c0_i32_1 = arith.constant 0 : i32
    return %c0_i32, %c0_i32_0 : i32, i32
  }
  func.func @transform_3(%arg0: i32) -> (i32, i32) {
    %c0_i32 = arith.constant 0 : i32
    %c0_i32_0 = arith.constant 0 : i32
    %c0_i32_1 = arith.constant 0 : i32
    return %c0_i32, %c0_i32_0 : i32, i32
  }
  func.func @transform_4(%arg0: i32) -> (i32, i32, i32) {
    %c0_i32 = arith.constant 0 : i32
    %c0_i32_0 = arith.constant 0 : i32
    %c0_i32_1 = arith.constant 0 : i32
    return %arg0, %c0_i32, %c0_i32_0 : i32, i32, i32
  }
}

</mosaic_0001>

<bundles_post_ra>
// kernel: tpu_custom_call.1
= control target key start
LH: loop header
LB: loop body
LE: loop exit
PB: predicated region body
PF: predicated region fallthrough
CT: control target
= control target key end

     0   :  { %9 = vsyncpa [#allocation3], 0  ;;  %s1842_s0 = inlined_call_operand.hbm [shape: f32[2,8,128], index: 0, kind: input, shape index: {}]   ;;  %s1843_s1 = inlined_call_operand.hbm [shape: f32[128,384], index: 1, kind: input, shape index: {}]   ;;  %s1844_s2 = inlined_call_operand.hbm [shape: f32[128,128], index: 2, kind: input, shape index: {}]   ;;  %s1845_s3 = inlined_call_operand.vmem [shape: f32[1,128], index: 3, kind: input, shape index: {}]   ;;  %s1846_s4 = inlined_call_operand.hbm [shape: f32[2,8,128], index: 4, kind: output, shape index: {}]  }
   0x1   :  { %11 = vsyncpa [#allocation3 + $0x1], 0 }
   0x2   :  { %12 = vsyncpa [#allocation6], 0 }
   0x3   :  { %13 = vsyncpa [#allocation4], 0 }
   0x4   :  { %15 = vsyncpa [#allocation4 + $0x1], 0  ;;  %s1553_s15 = smov 0   ;;  %s1555_s16 = smov 0  }
   0x5   :  { %s1557_s17 = smov 0   ;;  %s1559_s18 = smov 0  }
   0x6 LB: > { %s1574_s19 = sadd.s32 4294967295, %s1514_s18   ;;  %s1034_s20 = sadd.s32 4294967294, %s1514_s18   ;;  %s1514_s18 = sphi %s1559_s18, %s1866_s18   ;;  %s1510_s17 = sphi %s1557_s17, %s1865_s17   ;;  %s1506_s16 = sphi %s1555_s16, %s1864_s16   ;;  %s1502_s15 = sphi %s1553_s15, %s1863_s15  }
   0x7   : > { %p41_p0 = scmp.ne.s32.totalorder %s1506_s16, %s1502_s15  ;;  %p1847_p1 = scmp.eq.s32.totalorder %s1574_s19, 0 }
   0x8   : > { %p134_p3 = scmp.eq.s32.totalorder %s1034_s20, 1  ;;  %p1035_p5 = scmp.ge.s32.totalorder %s1514_s18, 1 }
   0x9   : > { %p1583_p4 = por %p1847_p1, %p41_p0  ;;  %p141_p7 = scmp.lt.s32.totalorder %s1514_s18, 3 }
   0xa   : > { %p1588_p6 = por %p134_p3, %p41_p0  ;;  %s1516_s24 = smov [#allocation5]  }
   0xb   : > { %s1850_s21 = scalar_select %p1583_p4, 1, 0 }
   0xc   : > { %s1851_s22 = scalar_select %p1588_p6, 1, 0 }
   0xd   : > { %p1593_p8 = pnand %p1035_p5, %p141_p7  ;;  %s153_s25 = sshll.u32 %s1516_s24, 4  ;;  %s1597_s25 = int_to_ptr.vmem [resolvable:$true] %s153_s25 }
   0xe   : > { %s1517_s27 = smov [#allocation7]   ;;  %s1358_s5 = scalar_lea.hbm %s1843_s1, 6144 }
   0xf   : > { %p1287_p9 = pneg %p1593_p8  ;;  %s166_s28 = sshll.u32 %s1517_s27, 4  ;;  %s1608_s28 = int_to_ptr.vmem [resolvable:$true] %s166_s28 }
  0x10   : > { %p1359_p12 = scmp.ne.s32.totalorder %s1843_s1, %s1358_s5  ;;  %p1365_p5 = scmp.lt.u32.totalorder %s1358_s5, %s1843_s1 }
  0x11   : > { %p1604_p11 = pnand %p1287_p9, %p1847_p1 }
  0x13   : > { %p1360_p13 = pneg %p1604_p11 }
  0x15   : > { %p1361_p0 = pnand %p1360_p13, %p1359_p12 }
  0x17   : > { %p1362_p3 = pneg %p1361_p0 }
  0x19   : > { %p1367_p7 = pnand %p1365_p5, %p1362_p3 }
  0x1b   : > { %1370 = shalt.err (!%p1367_p7)
}
  0x1c   : > { %s1371_s10 = scalar_lea.vmem %s1597_s25, 6144  ;;  %p1379_p2 = scmp.lt.s32.totalorder %s1597_s25, %s1597_s25 }
  0x1d   : > { %p1372_p9 = scmp.ne.s32.totalorder %s1597_s25, %s1371_s10  ;;  %p1380_p12 = scmp.lt.s32.totalorder %s1371_s10, %s1371_s10 }
  0x1f   : > { %p1374_p10 = pnand %p1372_p9, %p1360_p13  ;;  %p1381_p0 = por %p1380_p12, %p1379_p2 }
  0x21   : > { %p1375_p1 = pneg %p1374_p10 }
  0x23   : > { %p1382_p6 = pnand %p1381_p0, %p1375_p1 }
  0x25   : > { %1385 = shalt.err (!%p1382_p6)
}
  0x26   : > { %s1518_s11 = smov 384   ;;  %s1519_s12 = smov 24  }
  0x27   : > { %1290 = dma.hbm_to_vmem [thread:$0]  (!%p1604_p11), %s1843_s1, 6144, %s1597_s25, [#allocation6], %s1518_s11, %s1518_s11, %s1519_s12  }
  0x28   : > { %s1386_s27 = scalar_lea.hbm %s1844_s2, 2048 }
  0x29   : > { %p1387_p2 = scmp.ne.s32.totalorder %s1844_s2, %s1386_s27  ;;  %p1393_p10 = scmp.lt.u32.totalorder %s1386_s27, %s1844_s2 }
  0x2b   : > { %p1389_p1 = pnand %p1387_p2, %p1360_p13 }
  0x2d   : > { %p1390_p6 = pneg %p1389_p1 }
  0x2f   : > { %p1395_p3 = pnand %p1393_p10, %p1390_p6 }
  0x31   : > { %1398 = shalt.err (!%p1395_p3)
}
  0x32   : > { %s1399_s25 = scalar_lea.vmem %s1608_s28, 2048  ;;  %p1407_p12 = scmp.lt.s32.totalorder %s1608_s28, %s1608_s28 }
  0x33   : > { %p1400_p5 = scmp.ne.s32.totalorder %s1608_s28, %s1399_s25  ;;  %p1408_p0 = scmp.lt.s32.totalorder %s1399_s25, %s1399_s25 }
  0x35   : > { %p1402_p7 = pnand %p1400_p5, %p1360_p13  ;;  %p1409_p2 = por %p1408_p0, %p1407_p12 }
  0x37   : > { %p1403_p9 = pneg %p1402_p7 }
  0x39   : > { %p1410_p1 = pnand %p1409_p2, %p1403_p9 }
  0x3b   : > { %1413 = shalt.err (!%p1410_p1)
}
  0x3c   : > { %s1520_s7 = smov 128   ;;  %s1521_s8 = smov 8  }
  0x3d   : > { %1293 = dma.hbm_to_vmem [thread:$0]  (!%p1604_p11), %s1844_s2, 2048, %s1608_s28, [#allocation6], %s1520_s7, %s1520_s7, %s1521_s8  }
  0x3e   : > { %s1663_s11 = sadd.s32 1, %s1514_s18   ;;  %s28_s13 = sadd.s32 1, %s1510_s17 }
  0x3f   : > { %s25_s12 = ssub.s32 %s1514_s18, %s1663_s11  ;;  %p35_p6 = scmp.ne.s32.totalorder %s1510_s17, %s1506_s16 }
  0x40   : > { %p26_p13 = scmp.eq.s32.totalorder %s25_s12, 0  ;;  %p36_p10 = scmp.eq.s32.totalorder %s1514_s18, 0 }
  0x41   : > { %p1854_p5 = scmp.eq.s32.totalorder %s1574_s19, 1  ;;  %p1304_p9 = scmp.lt.s32.totalorder %s1514_s18, 2 }
  0x42   : > { %s1672_s14 = scalar_select %p26_p13, %s1510_s17, %s28_s13  }
  0x43   : > { %p37_p3 = por %p36_p10, %p35_p6  ;;  %p1676_p7 = por %p1854_p5, %p35_p6 }
  0x44   : > { %s183_s26 = sand.u32 1, %s1510_s17   ;;  %s1040_s28 = sshll.u32 %s1514_s18, 7 }
  0x45   : > { %s1855_s20 = scalar_select %p1676_p7, 1, 0 }
  0x46   : > { %s1039_s24 = sshll.u32 %s183_s26, 3  ;;  %s1686_s30 = scalar_lea.hbm %s1842_s0, %s1040_s28 }
  0x47   : > { %s187_s5 = scalar_lea.vmem [#allocation2], %s1039_s24  ;;  %p1690_p11 = pnand %p1304_p9, %p37_p3 }
  0x48   : > { %s194_s6 = sshll.u32 %s187_s5, 4  ;;  %s184_s7 = scalar_lea.sflag [#allocation3], %s183_s26  ;;  %s1688_s6 = int_to_ptr.vmem [resolvable:$true] %s194_s6 }
  0x49   : > { %s1414_s8 = scalar_lea.hbm %s1686_s30, 128  ;;  %p1416_p0 = pneg %p1690_p11 }
  0x4a   : > { %p1415_p12 = scmp.ne.s32.totalorder %s1686_s30, %s1414_s8  ;;  %s1419_s12 = scalar_lea.hbm %s1842_s0, 256 }
  0x4b   : > { %p1420_p13 = scmp.lt.u32.totalorder %s1686_s30, %s1842_s0  ;;  %p1421_p6 = scmp.lt.u32.totalorder %s1419_s12, %s1414_s8 }
  0x4c   : > { %p1417_p2 = pnand %p1416_p0, %p1415_p12  ;;  %p1423_p3 = scmp.lt.u32.totalorder %s1414_s8, %s1686_s30 }
  0x4d   : > { %p1422_p10 = por %p1421_p6, %p1420_p13 }
  0x4e   : > { %p1418_p1 = pneg %p1417_p2 }
  0x4f   : > { %p1424_p5 = por %p1423_p3, %p1422_p10 }
  0x51   : > { %p1425_p9 = pnand %p1424_p5, %p1418_p1 }
  0x53   : > { %1428 = shalt.err (!%p1425_p9)
}
  0x54   : > { %s1429_s26 = scalar_lea.vmem %s1688_s6, 128  ;;  %s1522_s28 = smov [#allocation2]  }
  0x55   : > { %p1430_p12 = scmp.ne.s32.totalorder %s1688_s6, %s1429_s26  ;;  %s1434_s27 = sshll.u32 %s1522_s28, 4  ;;  %s1435_s27 = int_to_ptr.vmem [resolvable:$false] %s1434_s27 }
  0x56   : > { %s1436_s29 = scalar_lea.vmem %s1435_s27, 256  ;;  %p1437_p4 = scmp.lt.s32.totalorder %s1688_s6, %s1435_s27 }
  0x57   : > { %p1432_p2 = pnand %p1430_p12, %p1416_p0  ;;  %p1438_p13 = scmp.lt.s32.totalorder %s1436_s29, %s1429_s26 }
  0x59   : > { %p1433_p7 = pneg %p1432_p2  ;;  %p1439_p6 = por %p1438_p13, %p1437_p4 }
  0x5b   : > { %p1440_p10 = pnand %p1439_p6, %p1433_p7 }
  0x5d   : > { %1443 = shalt.err (!%p1440_p10)
}
  0x5e   : > { %1297 = dma.hbm_to_vmem [thread:$0]  (!%p1690_p11), %s1686_s30, 128, %s1688_s6, %s184_s7  }
  0x5f   : > { %203 = sbr.rel (%p1593_p8) target bundleno = 1287 (0x507), region = 36  ;;  %s1722_s5 = sand.u32 (!%p1593_p8), 1, %s1506_s16  }
  0x60   : > { %s1042_s8 = sshll.u32 (!%p1593_p8), %s1722_s5, 3  ;;  %s206_s9 = scalar_lea.sflag (!%p1593_p8), [#allocation3], %s1722_s5 }
  0x61   : > { %s1728_s10 = scalar_lea.vmem (!%p1593_p8), [#allocation2], %s1042_s8  ;;  %p1857_p4 = scmp.ne.s32.totalorder (!%p1593_p8), %s1850_s21, 0 }
  0x66   : > { %1489 = dma.done.wait (%p1857_p4), %s206_s9, 128  }
  0x67   : > { %1491 = vsyncadd (%p1857_p4), %s206_s9, 4294967168  ;;  %p1858_p7 = scmp.eq.s32.totalorder %s1574_s19, 0 }
  0x69   : > { %1493 = dma.done.wait (%p1858_p7), [#allocation6], 8192   ;;  %p1859_p8 = pmov %p1858_p7 }
  0x6a   : > { %v1523_v0 = vmov 0.0   ;;  %v244_v1 = vld [vmem:[#allocation5 + $0x8] sm:$0xff]  ;;  %v247_v2 = vld [vmem:[#allocation5 + $0x20] sm:$0xff]  ;;  %v246_v5 = vld [vmem:[#allocation5 + $0x18] sm:$0xff]  ;;  %vm1524_vm0 = vmmov 0   ;;  %v1525_v53 = vmov 0.0|0.0  }
  0x6b   : > { %1495 = vsyncadd (%p1859_p8), [#allocation6], 4294959104  ;;  %355 = vmatprep.mubr.f32.mxu0 %v1523_v0  ;;  %v243_v3 = vld [vmem:[#allocation5] sm:$0xff]  ;;  %v1195_v4 = vpack.c.bf16 %v247_v2, %v244_v1  ;;  %v250_v6 = vld [vmem:[#allocation5 + $0x38] sm:$0xff]  ;;  %1134 = vmatprep.mubr.msk.f32.mxu1 %vm1524_vm0, %v1523_v0  ;;  %vm448_vm1 = vcmask 523264   ;;  %s1526_s21 = smov 64  }
  0x6c   : > { %v253_v7 = vld [vmem:[#allocation5 + $0x50] sm:$0xff]  ;;  %v1197_v8 = vpack.c.bf16 %v246_v5, %v243_v3  ;;  %v252_v11 = vld [vmem:[#allocation5 + $0x48] sm:$0xff]  ;;  %v259_v13 = vld [vmem:[#allocation5 + $0x80] sm:$0xff]  ;;  %1227 = vmatprep.subr.bf16.mxu1 %v1525_v53  ;;  %vm525_vm2 = vcmask 64512   ;;  %s1056_s6 = sshll.u32 %s1574_s19, 7  ;;  %s241_s25 = scalar_lea.vmem [#allocation8], %s1042_s8 }
  0x6d   : > { %v1199_v9 = vpack.c.bf16 %v253_v7, %v250_v6  ;;  %v249_v10 = vld [vmem:[#allocation5 + $0x30] sm:$0xff]  ;;  %v256_v12 = vld [vmem:[#allocation5 + $0x68] sm:$0xff]  ;;  %1196 = vmatprep.subr.bf16.mxu0 %v1195_v4  ;;  %v255_v16 = vld [vmem:[#allocation5 + $0x60] sm:$0xff]  ;;  %s945_s7 = sshll.u32 %s241_s25, 4  ;;  %s1798_s24 = scalar_lea.hbm %s1846_s4, %s1056_s6  ;;  %s1800_s7 = int_to_ptr.vmem [resolvable:$true] %s945_s7 }
  0x6e   : > { %1198 = vmatpush1.bf16.msra.mxu0 %v1197_v8  ;;  %v1201_v14 = vpack.c.bf16 %v252_v11, %v249_v10  ;;  %v1203_v15 = vpack.c.bf16 %v259_v13, %v256_v12  ;;  %v258_v17 = vld [vmem:[#allocation5 + $0x78] sm:$0xff]  ;;  %v265_v19 = vld [vmem:[#allocation5 + $0xb0] sm:$0xff]  ;;  %v264_v23 = vld [vmem:[#allocation5 + $0xa8] sm:$0xff]  ;;  %s932_s26 = scalar_lea.sflag [#allocation4], %s1722_s5  ;;  %s1444_s28 = scalar_lea.vmem %s1800_s7, 128 }
  0x6f   : > { %1200 = vmatprep.subr.bf16.mxu0 %v1199_v9  ;;  %v262_v18 = vld [vmem:[#allocation5 + $0x98] sm:$0xff]  ;;  %v1205_v20 = vpack.c.bf16 %v258_v17, %v255_v16  ;;  %v261_v22 = vld [vmem:[#allocation5 + $0x90] sm:$0xff]  ;;  %v268_v24 = vld [vmem:[#allocation5 + $0xc8] sm:$0xff]  ;;  %p1445_p11 = scmp.ne.s32.totalorder %s1800_s7, %s1444_s28  ;;  %p1860_p0 = scmp.ne.s32.totalorder %s1855_s20, 0 }
  0x70   : > { %v1207_v21 = vpack.c.bf16 %v265_v19, %v262_v18  ;;  %v271_v25 = vld [vmem:[#allocation5 + $0xe0] sm:$0xff]  ;;  %v1209_v26 = vpack.c.bf16 %v264_v23, %v261_v22  ;;  %v270_v29 = vld [vmem:[#allocation5 + $0xd8] sm:$0xff]  ;;  %v277_v31 = vld [vmem:[#allocation5 + $0x110] sm:$0xff]  ;;  %s1527_s19 = smov [#allocation8]  }
  0x71   : > { %v1211_v27 = vpack.c.bf16 %v271_v25, %v268_v24  ;;  %v267_v28 = vld [vmem:[#allocation5 + $0xc0] sm:$0xff]  ;;  %v274_v30 = vld [vmem:[#allocation5 + $0xf8] sm:$0xff]  ;;  %v273_v34 = vld [vmem:[#allocation5 + $0xf0] sm:$0xff]  ;;  %p1446_p1 = pnand %p1445_p11, %p1860_p0  ;;  %s1448_s27 = sshll.u32 %s1527_s19, 4  ;;  %s1449_s27 = int_to_ptr.vmem [resolvable:$false] %s1448_s27 }
  0x72   : > { %1202 = vmatpush1.bf16.msra.mxu0 %v1201_v14  ;;  %v1213_v32 = vpack.c.bf16 %v270_v29, %v267_v28  ;;  %v1215_v33 = vpack.c.bf16 %v277_v31, %v274_v30  ;;  %v276_v35 = vld [vmem:[#allocation5 + $0x108] sm:$0xff]  ;;  %v283_v37 = vld [vmem:[#allocation5 + $0x140] sm:$0xff]  ;;  %v282_v41 = vld [vmem:[#allocation5 + $0x138] sm:$0xff]  ;;  %s1450_s29 = scalar_lea.vmem %s1449_s27, 256  ;;  %p1451_p5 = scmp.lt.s32.totalorder %s1800_s7, %s1449_s27 }
  0x73   : > { %1204 = vmatprep.subr.bf16.mxu0 %v1203_v15  ;;  %v280_v36 = vld [vmem:[#allocation5 + $0x128] sm:$0xff]  ;;  %v1217_v38 = vpack.c.bf16 %v276_v35, %v273_v34  ;;  %v279_v40 = vld [vmem:[#allocation5 + $0x120] sm:$0xff]  ;;  %v286_v42 = vld [vmem:[#allocation5 + $0x158] sm:$0xff]  ;;  %p1447_p3 = pneg %p1446_p1  ;;  %p1452_p9 = scmp.lt.s32.totalorder %s1450_s29, %s1444_s28 }
  0x74   : > { %v1219_v39 = vpack.c.bf16 %v283_v37, %v280_v36  ;;  %v289_v43 = vld [vmem:[#allocation5 + $0x170] sm:$0xff]  ;;  %v1221_v44 = vpack.c.bf16 %v282_v41, %v279_v40  ;;  %v288_v47 = vld [vmem:[#allocation5 + $0x168] sm:$0xff]  ;;  %v251_v52 = vld [vmem:[#allocation5 + $0x40] sm:$0xff] }
  0x75   : > { %v1223_v45 = vpack.c.bf16 %v289_v43, %v286_v42  ;;  %v285_v46 = vld [vmem:[#allocation5 + $0x150] sm:$0xff]  ;;  %v248_v51 = vld [vmem:[#allocation5 + $0x28] sm:$0xff]  ;;  %v254_v55 = vld [vmem:[#allocation5 + $0x58] sm:$0xff]  ;;  %p1453_p12 = por %p1452_p9, %p1451_p5 }
  0x76   : > { %1206 = vmatpush1.bf16.msra.mxu0 %v1205_v20  ;;  %v1225_v48 = vpack.c.bf16 %v288_v47, %v285_v46  ;;  %v242_v49 = vld [vmem:[%s1728_s10] sm:$0xff]  ;;  %v1231_v56 = vpack.c.bf16 %v254_v55, %v251_v52  ;;  %v260_v58 = vld [vmem:[#allocation5 + $0x88] sm:$0xff]  ;;  %v263_v62 = vld [vmem:[#allocation5 + $0xa0] sm:$0xff] }
  0x77   : > { %1208 = vmatprep.subr.bf16.mxu0 %v1207_v21  ;;  %v245_v50 = vld [vmem:[#allocation5 + $0x10] sm:$0xff]  ;;  %v266_v63 = vld [vmem:[#allocation5 + $0xb8] sm:$0xff]  ;;  %v272_v3 = vld [vmem:[#allocation5 + $0xe8] sm:$0xff]  ;;  %p1454_p2 = pnand %p1453_p12, %p1447_p3 }
  0x78   : > { %v1228_v54 = vpack.c.bf16 %v248_v51, %v245_v50  ;;  %v257_v57 = vld [vmem:[#allocation5 + $0x70] sm:$0xff]  ;;  %v1237_v1 = vpack.c.bf16 %v266_v63, %v263_v62  ;;  %v275_v5 = vld [vmem:[#allocation5 + $0x100] sm:$0xff]  ;;  %v278_v6 = vld [vmem:[#allocation5 + $0x118] sm:$0xff] }
  0x79   : > { %v1234_v60 = vpack.c.bf16 %v260_v58, %v257_v57  ;;  %v269_v2 = vld [vmem:[#allocation5 + $0xd0] sm:$0xff]  ;;  %v1243_v7 = vpack.c.bf16 %v278_v6, %v275_v5  ;;  %v284_v9 = vld [vmem:[#allocation5 + $0x148] sm:$0xff]  ;;  %v287_v11 = vld [vmem:[#allocation5 + $0x160] sm:$0xff] }
  0x7a   : > { %1210 = vmatpush1.bf16.msra.mxu0 %v1209_v26  ;;  %1229 = vmatpush3.bf16.msra.mxu1 %v1228_v54  ;;  %v1240_v4 = vpack.c.bf16 %v272_v3, %v269_v2  ;;  %v281_v8 = vld [vmem:[#allocation5 + $0x130] sm:$0xff]  ;;  %v290_v12 = vld [vmem:[#allocation5 + $0x178] sm:$0xff]  ;;  %v433_v34 = vld [vmem:[#allocation7 + $0x8] sm:$0xff] }
  0x7b   : > { %1212 = vmatprep.subr.bf16.mxu0 %v1211_v27  ;;  %1230 = vmatprep.subr.bf16.mxu1 %v1525_v53  ;;  %v1246_v10 = vpack.c.bf16 %v284_v9, %v281_v8  ;;  %v1249_v13 = vpack.c.bf16 %v290_v12, %v287_v11  ;;  %v434_v36 = vld [vmem:[#allocation7 + $0x10] sm:$0xff]  ;;  %v435_v37 = vld [vmem:[#allocation7 + $0x18] sm:$0xff]  ;;  %v436_v41 = vld [vmem:[#allocation7 + $0x20] sm:$0xff] }
  0x7c   : > { %v1267_v40 = vpack.c.bf16 %v435_v37, %v434_v36  ;;  %v437_v42 = vld [vmem:[#allocation7 + $0x28] sm:$0xff]  ;;  %v440_v47 = vld [vmem:[#allocation7 + $0x40] sm:$0xff]  ;;  %v443_v51 = vld [vmem:[#allocation7 + $0x58] sm:$0xff] }
  0x7d   : > { %v1270_v43 = vpack.c.bf16 %v437_v42, %v436_v41  ;;  %v445_v54 = vld [vmem:[#allocation7 + $0x68] sm:$0xff]  ;;  %v447_v57 = vld [vmem:[#allocation7 + $0x78] sm:$0xff]  ;;  %v1054_v8 = vld [vmem:[%s1845_s3] ss:$0 sm:$0xff] }
  0x7e   : > { %1214 = vmatpush1.bf16.msra.mxu0 %v1213_v32  ;;  %1232 = vmatpush3.bf16.msra.mxu1 %v1231_v56  ;;  %v446_v56 = vld [vmem:[#allocation7 + $0x70] sm:$0xff] }
  0x7f   : > { %1216 = vmatprep.subr.bf16.mxu0 %v1215_v33  ;;  %1233 = vmatprep.subr.bf16.mxu1 %v1525_v53  ;;  %v432_v33 = vld [vmem:[#allocation7] sm:$0xff]  ;;  %v1261_v58 = vpack.c.bf16 %v447_v57, %v446_v56 }
  0x80   : > { %v1264_v35 = vpack.c.bf16 %v433_v34, %v432_v33 }
  0x82   : > { %1218 = vmatpush1.bf16.msra.mxu0 %v1217_v38  ;;  %1235 = vmatpush3.bf16.msra.mxu1 %v1234_v60 }
  0x83   : > { %1220 = vmatprep.subr.bf16.mxu0 %v1219_v39  ;;  %1236 = vmatprep.subr.bf16.mxu1 %v1525_v53 }
  0x86   : > { %1222 = vmatpush1.bf16.msra.mxu0 %v1221_v44  ;;  %1238 = vmatpush3.bf16.msra.mxu1 %v1237_v1  ;;  %v438_v44 = vld [vmem:[#allocation7 + $0x30] sm:$0xff] }
  0x87   : > { %1224 = vmatprep.subr.bf16.mxu0 %v1223_v45  ;;  %1239 = vmatprep.subr.bf16.mxu1 %v1525_v53  ;;  %v439_v45 = vld [vmem:[#allocation7 + $0x38] sm:$0xff] }
  0x88   : > { %v1273_v46 = vpack.c.bf16 %v439_v45, %v438_v44 }
  0x8a   : > { %1226 = vmatpush1.bf16.msra.mxu0 %v1225_v48  ;;  %1241 = vmatpush3.bf16.msra.mxu1 %v1240_v4  ;;  %v441_v48 = vld [vmem:[#allocation7 + $0x48] sm:$0xff] }
  0x8b   : > { %1137 = vmatprep.subr.mxu0 %v1523_v0  ;;  %1242 = vmatprep.subr.bf16.mxu1 %v1525_v53  ;;  %v1252_v50 = vpack.c.bf16 %v441_v48, %v440_v47 }
  0x8d   : > { %356 = vmatmul.mubr.f32.vlgmr.msra.gmra.mrb[0].mxu0 %v242_v49 }
  0x8e   : > { %1139 = vmatprep.mubr.msk.f32.mxu0 %vm1524_vm0, %v1523_v0  ;;  %1244 = vmatpush3.bf16.msra.mxu1 %v1243_v7 }
  0x8f   : > { %1245 = vmatprep.subr.bf16.mxu1 %v1525_v53 }
  0x92   : > { %1247 = vmatpush3.bf16.msra.mxu1 %v1246_v10 }
  0x93   : > { %1248 = vmatprep.subr.bf16.mxu1 %v1525_v53 }
  0x96   : > { %1250 = vmatpush3.bf16.msra.mxu1 %v1249_v13 }
  0x97   : > { %1142 = vmatprep.subr.mxu1 %v1523_v0 }
  0x99   : > { %1135 = vmatmul.mubr.f32.vlgmr.msra.gmra.mrb[0].mxu1 %v242_v49  ;;  %v442_v49 = vld [vmem:[#allocation7 + $0x50] sm:$0xff] }
  0x9a   : > { %1144 = vmatprep.mubr.msk.f32.mxu1 %vm1524_vm0, %v1523_v0  ;;  %v1255_v52 = vpack.c.bf16 %v443_v51, %v442_v49 }
 0x160   : > { %v357_v59 = vpop.f32.mrb[0].mxu0 }
 0x161   : > { %v359_v61 = vpop.f32.mrb[1].mxu0 }
 0x162   : > { %612 = vrot.lane.b32.xlu0 %v359_v61, %s1526_s21  ;;  %1138 = vmatpush3.xpose.msk.msra.mxu0 %vm448_vm1, %v359_v61 }
 0x163   : > { %1147 = vmatprep.subr.mxu0 %v1523_v0 }
 0x165   : > { %1140 = vmatmul.mubr.msk.f32.vlgmr.msra.gmra.mrb[2].mxu0 %vm448_vm1, %v357_v59 }
 0x166   : > { %610 = vrot.lane.b32.xlu0 %v357_v59, %s1526_s21  ;;  %1149 = vmatprep.mubr.msk.f32.mxu0 %vm1524_vm0, %v1523_v0 }
 0x16c   : > { %v428_v19 = vpop.f32.mrb[0].mxu1 }
 0x16d   : > { %v1136_v20 = vpop.f32.mrb[1].mxu1  ;;  %1143 = vmatpush3.msra.mxu1 %v428_v19  ;;  %698 = vrot.lane.b32.xlu0 %v428_v19, %s1526_s21 }
 0x16e   : > { %1152 = vmatprep.subr.mxu1 %v1523_v0 }
 0x1d4   : > { %v613_v14 = vpop.permute.xlu0 %612 }
 0x1d5   : > { %1148 = vmatpush3.xpose.msk.msra.mxu0 %vm448_vm1, %v613_v14 }
 0x1d6   : > { %1251 = vmatprep.subr.bf16.mxu0 %v1525_v53 }
 0x1d8   : > { %v611_v15 = vpop.permute.xlu0 %610 }
 0x1d9   : > { %1150 = vmatmul.mubr.msk.f32.vlgmr.msra.gmra.mrb[4].mxu0 %vm448_vm1, %v611_v15 }
 0x1da   : > { %1173 = vmatprep.mubr.msk.f32.mxu0 %vm1524_vm0, %v1523_v0  ;;  %1253 = vmatpush3.bf16.msra.mxu0 %v1252_v50 }
 0x1db   : > { %1254 = vmatprep.subr.bf16.mxu0 %v1525_v53 }
 0x1de   : > { %1256 = vmatpush3.bf16.msra.mxu0 %v1255_v52 }
 0x1df   : > { %v699_v27 = vpop.permute.xlu0 %698  ;;  %1257 = vmatprep.subr.bf16.mxu0 %v1525_v53 }
 0x238   : > { %v521_v16 = vpop.f32.mrb[2].mxu0 }
 0x239   : > { %v1141_v17 = vpop.f32.mrb[3].mxu0  ;;  %v526_v18 = vsel %vm525_vm2, %v521_v16, -inf }
 0x23a   : > { %527 = vmax.xlane.f32.xlu1 %v526_v18 }
 0x2ac   : > { %v684_v21 = vpop.f32.mrb[4].mxu0 }
 0x2ad   : > { %v1151_v22 = vpop.f32.mrb[5].mxu0  ;;  %v688_v23 = vsel %vm525_vm2, %v684_v21, -inf }
 0x2ae   : > { %689 = vmax.xlane.f32.xlu1 %v688_v23 }
 0x2c7   : > { %v528_v24 = vpop.xlane.xlu1 %527 }
 0x2c8   : > { %v529_v25 = vsub.f32 %v521_v16, %v528_v24 }
 0x2ca   : > { %v530_v26 = vmul.f32 1.442695, %v529_v25 }
 0x2cc   : > { %1350 = vpow2.f32 %v530_v26 }
 0x2d6   : > { %v1351_v28 = vpop.eup %1350 }
 0x2d7   : > { %1145 = vmatmul.mubr.msk.f32.vlgmr.msra.gmra.mrb[2].mxu1 %vm525_vm2, %v1351_v28  ;;  %v532_v29 = vsel %vm525_vm2, %v1351_v28, 0.0 }
 0x2d8   : > { %533 = vadd.xlane.f32.xlu1 %v532_v29  ;;  %1153 = vmatpush3.msra.mxu1 %v699_v27 }
 0x2d9   : > { %1154 = vmatprep.mubr.msk.f32.mxu1 %vm1524_vm0, %v1523_v0  ;;  %1263 = vmatprep.subr.bf16.mxu1 %v1525_v53 }
 0x33b   : > { %v690_v30 = vpop.xlane.xlu1 %689 }
 0x33c   : > { %v691_v31 = vsub.f32 %v684_v21, %v690_v30 }
 0x33e   : > { %v692_v32 = vmul.f32 1.442695, %v691_v31 }
 0x340   : > { %1352 = vpow2.f32 %v692_v32 }
 0x34a   : > { %v1353_v38 = vpop.eup %1352 }
 0x34b   : > { %1155 = vmatmul.mubr.msk.f32.vlgmr.msra.gmra.mrb[4].mxu1 %vm525_vm2, %v1353_v38  ;;  %v694_v39 = vsel %vm525_vm2, %v1353_v38, 0.0 }
 0x34c   : > { %695 = vadd.xlane.f32.xlu0 %v694_v39  ;;  %1265 = vmatpush3.bf16.msra.mxu1 %v1264_v35 }
 0x34d   : > { %1266 = vmatprep.subr.bf16.mxu1 %v1525_v53  ;;  %1192 = vmatprep.mubr.msk.f32.mxu1 %vm1524_vm0, %v1523_v0  ;;  %v444_v0 = vld [vmem:[#allocation7 + $0x60] sm:$0xff] }
 0x34e   : > { %v1258_v55 = vpack.c.bf16 %v445_v54, %v444_v0 }
 0x350   : > { %1268 = vmatpush3.bf16.msra.mxu1 %v1267_v40  ;;  %1259 = vmatpush3.bf16.msra.mxu0 %v1258_v55 }
 0x351   : > { %1269 = vmatprep.subr.bf16.mxu1 %v1525_v53  ;;  %1260 = vmatprep.subr.bf16.mxu0 %v1525_v53 }
 0x354   : > { %1271 = vmatpush3.bf16.msra.mxu1 %v1270_v43  ;;  %1262 = vmatpush3.bf16.msra.mxu0 %v1261_v58 }
 0x355   : > { %1272 = vmatprep.subr.bf16.mxu1 %v1525_v53 }
 0x358   : > { %1274 = vmatpush3.bf16.msra.mxu1 %v1273_v46 }
 0x365   : > { %v534_v59 = vpop.xlane.xlu1 %533 }
 0x366   : > { %1354 = vrcp.f32 %v534_v59 }
 0x370   : > { %v1355_v60 = vpop.eup %1354 }
 0x3aa   : > { %v604_v61 = vpop.f32.mrb[2].mxu1 }
 0x3ab   : > { %v609_v62 = vmul.f32 %v1355_v60, %v604_v61  ;;  %v1146_v63 = vpop.f32.mrb[3].mxu1 }
 0x3ad   : > { %1193 = vmatmul.mubr.msk.f32.vlgmr.msra.gmra.mrb[6].mxu1 %vm448_vm1, %v609_v62 }
 0x3d9   : > { %v696_v1 = vpop.xlane.xlu0 %695 }
 0x3da   : > { %1356 = vrcp.f32 %v696_v1 }
 0x3e4   : > { %v1357_v2 = vpop.eup %1356 }
 0x41e   : > { %v770_v3 = vpop.f32.mrb[4].mxu1 }
 0x41f   : > { %v775_v4 = vmul.f32 %v1357_v2, %v770_v3  ;;  %v1156_v53 = vpop.f32.mrb[5].mxu1 }
 0x421   : > { %1174 = vmatmul.mubr.msk.f32.vlgmr.msra.gmra.mrb[6].mxu0 %vm448_vm1, %v775_v4 }
 0x480   : > { %v918_v5 = vpop.f32.mrb[6].mxu1 }
 0x481   : > { %v1194_v6 = vpop.f32.mrb[7].mxu1 }
 0x4f4   : > { %v845_v7 = vpop.f32.mrb[6].mxu0 }
 0x4f5   : > { %v919_v9 = vadd.f32 %v918_v5, %v845_v7  ;;  %v1175_v10 = vpop.f32.mrb[7].mxu0 }
 0x4f7   : > { %v929_v11 = vadd.f32 %v1054_v8, %v919_v9 }
 0x4f9   : > { %930 = vst [vmem:[%s241_s25] sm:$0xff] %v929_v11 }
 0x4fa   : > { %1457 = shalt.err (!%p1454_p2)
}
 0x4fb   : > { %s1458_s5 = scalar_lea.hbm %s1798_s24, 128  ;;  %s1462_s10 = scalar_lea.hbm %s1846_s4, 256 }
 0x4fc   : > { %p1459_p13 = scmp.ne.s32.totalorder %s1798_s24, %s1458_s5  ;;  %p1463_p4 = scmp.lt.u32.totalorder %s1798_s24, %s1846_s4 }
 0x4fd   : > { %p1464_p7 = scmp.lt.u32.totalorder %s1462_s10, %s1458_s5  ;;  %p1466_p11 = scmp.lt.u32.totalorder %s1458_s5, %s1798_s24 }
 0x4fe   : > { %p1460_p6 = pnand %p1459_p13, %p1860_p0 }
 0x4ff   : > { %p1465_p8 = por %p1464_p7, %p1463_p4 }
 0x500   : > { %p1461_p10 = pneg %p1460_p6 }
 0x501   : > { %p1467_p1 = por %p1466_p11, %p1465_p8 }
 0x503   : > { %p1468_p3 = pnand %p1467_p1, %p1461_p10 }
 0x505   : > { %1471 = shalt.err (!%p1468_p3)
}
 0x506   : > { %1285 = dma.vmem_to_hbm [thread:$0]  (%p1860_p0), %s1800_s7, 128, %s1798_s24, %s932_s26  }
 0x507 PF: > { %s957_s30 = sand.u32 1, %s1502_s15   ;;  %p1861_p5 = scmp.ne.s32.totalorder %s1851_s22, 0 }
 0x508   : > { %p1862_p9 = scmp.ge.s32.totalorder %s1514_s18, 2  ;;  %s958_s6 = scalar_lea.sflag [#allocation4], %s957_s30 }
 0x50a   : > { %p1299_p12 = pnand %p1862_p9, %p1861_p5 }
 0x50c   : > { %1497 = dma.done.wait (!%p1299_p12), %s958_s6, 128  }
 0x50d   : > { %1499 = vsyncadd (!%p1299_p12), %s958_s6, 4294967168  ;;  %p18_p2 = scmp.ge.s32.totalorder %s1663_s11, 4   ;;  %s1863_s15 = smov %s1506_s16 }
 0x50e   : > { %s1864_s16 = smov %s1510_s17  ;;  %s1865_s17 = smov %s1672_s14 }
 0x50f   : > { %s1866_s18 = smov %s1663_s11  ;;  %20 = sbr.rel (!%p18_p2) target bundleno = 6 (0x6), region = 89 }
 0x516   :  { %963 = vsyncpa [#allocation3], 1 }
 0x517   :  { %965 = vsyncpa [#allocation3 + $0x1], 1 }
 0x518   :  { %966 = vsyncpa [#allocation6], 1 }
 0x519   :  { %967 = vsyncpa [#allocation4], 1 }
 0x51a   :  { %969 = vsyncpa [#allocation4 + $0x1], 1 }

</bundles_post_ra>
